<compile_context>
chip_gen: v7x
topology: tpu7x:2x2x1
jax: 0.10.0
libtpu: 0.0.40
codegen_flags: <defaults>
</compile_context>

<pallas_src>
import jax
import jax.numpy as jnp
import numpy as np
from jax.experimental import pallas as pl
from jax.experimental.pallas import tpu as pltpu


# ----------------------------------------------------------------------------
# Generation-aware configuration: (tm_target, tm_multiple, lane_multiple, vmem_limit_bytes)
# ----------------------------------------------------------------------------
_GEN_CONFIG = {
    "v5e":     (256, 128, 128, 96 * (1 << 20)),   # 128 MiB phys; default scoped only 16 MiB
    "v6e":     (512, 256, 256, 104 * (1 << 20)),  # 128 MiB phys; default scoped 32 MiB
    "v7x":     (256, 256, 256, 52 * (1 << 20)),   # 64 MiB phys per TC; leave headroom
    "unknown": (256, 128, 128, 32 * (1 << 20)),
}


def _tpu_generation():
    try:
        kind = jax.devices()[0].device_kind.lower()
    except Exception:
        return "unknown"
    if "v7" in kind:
        return "v7x"
    if "v6" in kind:
        return "v6e"
    if "v5e" in kind or "v5 lite" in kind or "v5lite" in kind:
        return "v5e"
    return "unknown"


def _round_up(a, b):
    return (a + b - 1) // b * b


# ----------------------------------------------------------------------------
# Kernel bodies
# ----------------------------------------------------------------------------
def _normalize(x):
    # RevIN-style instance norm over time; torch.var is unbiased -> /(L-1).
    L = x.shape[1]
    mean = jnp.mean(x, axis=1, keepdims=True)              # [TM, 1]
    xc = x - mean
    var = jnp.sum(xc * xc, axis=1, keepdims=True) * (1.0 / (L - 1)) + 1e-5
    inv_std = jax.lax.rsqrt(var)                           # EUP; no VALU sqrt/div
    std = var * inv_std                                    # == sqrt(var)
    return xc * inv_std, mean, std


def _finalize(low_f32, mean, std, xy_ref, lxy_ref):
    lxy = low_f32 * std                                    # low_xy * sqrt(x_var)
    xy_ref[...] = (lxy + mean).astype(xy_ref.dtype)        # de-normalized forecast
    lxy_ref[...] = lxy.astype(lxy_ref.dtype)


def _fits_kernel_dense(x_ref, m_ref, bias_ref, xy_ref, lxy_ref):
    xn, mean, std = _normalize(x_ref[...])
    # Single full-K matmul: low = xn @ M_fused + b_low.  xn is cast to the
    # operator dtype (bf16 when matmul_dtype=bf16) for native MXU throughput.
    low = jnp.dot(xn.astype(m_ref.dtype), m_ref[...],
                  preferred_element_type=jnp.float32) + bias_ref[...]
    _finalize(low, mean, std, xy_ref, lxy_ref)


def _fits_kernel_factored(x_ref, a_ref, b_ref, bias_ref, xy_ref, lxy_ref):
    xn, mean, std = _normalize(x_ref[...])
    # Low-rank chain: spec = xn @ A  (rank 2*cut_freq, padded to Fk lanes),
    #                 low  = spec @ B + b_low.
    spec = jnp.dot(xn.astype(a_ref.dtype), a_ref[...],
                   preferred_element_type=jnp.float32)     # [TM, Fk]
    low = jnp.dot(spec.astype(b_ref.dtype), b_ref[...],
                  preferred_element_type=jnp.float32) + bias_ref[...]
    _finalize(low, mean, std, xy_ref, lxy_ref)


# ----------------------------------------------------------------------------
# Host-side operator construction (float64), dense or low-rank factored.
# ----------------------------------------------------------------------------
def make_fits_operator(seq_len, pred_len, cut_freq, wr, wi, br, bi, length_ratio,
                       *, matmul_dtype=jnp.float32):
    """Fuse rfft -> complex Linear -> zero-padded irfft -> *length_ratio into a
    real operator.  Returns (mode, mats, b_low):
      mode == "dense":    mats = (M [L, N],)          low = xn @ M + b_low
      mode == "factored": mats = (A [L, Fk], B [Fk, N]) low = (xn @ A) @ B + b_low
    wr/wi are the transposed complex weights [cut_freq, F2]; br/bi the bias [1, F2].
    """
    L = seq_len
    N = seq_len + pred_len
    F = cut_freq
    F2 = wr.shape[1]
    assert F <= L // 2 + 1, "cut_freq exceeds rfft bins of seq_len"
    assert F2 <= N // 2 + 1, "upsampled bins exceed rfft bins of seq_len+pred_len"
    # TODO(synk): odd N changes torch.fft.irfft's default output length; only even N supported.
    assert N % 2 == 0, "seq_len + pred_len must be even"

    # Forward rfft over seq_len, first F bins:  Re = xn@cosr, Im = xn@sinr.
    t = np.arange(L, dtype=np.float64)[:, None]
    f = np.arange(F, dtype=np.float64)[None, :]
    ang = 2.0 * np.pi * t * f / L
    cosr = np.cos(ang)                                     # [L, F]
    sinr = -np.sin(ang)                                    # [L, F]

    # irfft of length N from F2 bins (rest zero), with length_ratio folded in.
    f2 = np.arange(F2, dtype=np.float64)[:, None]
    t2 = np.arange(N, dtype=np.float64)[None, :]
    ang2 = 2.0 * np.pi * f2 * t2 / N
    scale = np.where((f2 == 0) | (f2 == N // 2), 1.0, 2.0) / N * length_ratio
    cr = np.cos(ang2) * scale                              # [F2, N]
    ci = -np.sin(ang2) * scale                             # [F2, N] (imag of DC/Nyq ignored)

    wr64 = np.asarray(wr, np.float64)                      # [F, F2] = Re(W)^T
    wi64 = np.asarray(wi, np.float64)                      # [F, F2] = Im(W)^T
    br64 = np.asarray(br, np.float64)                      # [1, F2]
    bi64 = np.asarray(bi, np.float64)                      # [1, F2]

    b_low = jnp.asarray(br64 @ cr + bi64 @ ci, jnp.float32)        # [1, N], kept f32

    # Low-rank factored form (rank 2F, padded to 128 lanes) when it saves both
    # FLOPs and constant VMEM vs the dense [L, N] matrix.
    Fk = _round_up(2 * F, 128)
    if Fk * (L + N) < L * N:
        A = np.zeros((L, Fk), np.float64)
        A[:, :F] = cosr
        A[:, F:2 * F] = sinr
        Bmat = np.zeros((Fk, N), np.float64)
        Bmat[:F] = wr64 @ cr + wi64 @ ci
        Bmat[F:2 * F] = wr64 @ ci - wi64 @ cr
        mats = (jnp.asarray(A, matmul_dtype), jnp.asarray(Bmat, matmul_dtype))
        return ("factored", mats, b_low)

    m_fused = cosr @ (wr64 @ cr + wi64 @ ci) + sinr @ (wr64 @ ci - wi64 @ cr)   # [L, N]
    return ("dense", (jnp.asarray(m_fused, matmul_dtype),), b_low)


# ----------------------------------------------------------------------------
# Wrapper
# ----------------------------------------------------------------------------
def fits_forward(x, op, *, out_dtype=jnp.float32):
    """x: [B, C, seq_len]; op from make_fits_operator.
    Returns (xy [B, C, N], low_xy*sqrt(x_var) [B, N, C]) like the torch module."""
    mode, mats, b_low = op
    B, C, L = x.shape
    N = b_low.shape[1]
    M = B * C
    assert L >= 2, "seq_len must be >= 2 (unbiased variance uses L-1)"

    gen = _tpu_generation()
    tm_target, tm_mult, lane_mult, vmem_limit = _GEN_CONFIG[gen]

    # Lane-dense output padding (unmasked vst + full-width MXU N tiles).
    if N >= 128:
        Np = _round_up(N, lane_mult)
    elif (-N) % 128 <= N:          # pad to one full vreg width if <= 2x overhead
        Np = 128
    else:
        Np = N
    pad_n = Np - N
    if pad_n:
        b_low = jnp.pad(b_low, ((0, 0), (0, pad_n)))
        mats = mats[:-1] + (jnp.pad(mats[-1], ((0, 0), (0, pad_n))),)

    # Per-step VMEM budget -> TM.  Constants are single-buffered (Buffered(1));
    # x is double-buffered, both outputs are double-buffered.
    out_bytes = jnp.dtype(out_dtype).itemsize
    const_bytes = sum(int(np.prod(m.shape)) * m.dtype.itemsize for m in mats) + Np * 4
    per_row = 2 * L * 4 + 2 * 2 * Np * out_bytes
    budget = max(int(0.7 * vmem_limit) - const_bytes, 8 * per_row)
    tm_cap = max(8, (budget // per_row) // 8 * 8)
    TM = max(8, min(tm_target, tm_cap))
    if TM >= tm_mult:
        TM = TM // tm_mult * tm_mult                       # MXU-friendly multiple
    TM = min(TM, _round_up(M, 8))
    if gen == "v7x" and TM >= M >= 16:
        TM = _round_up(-(-M // 2), 8)                      # >= 2 grid steps for 2 TCs

    x2 = x.reshape(M, L).astype(jnp.float32)
    Mp = _round_up(M, TM)
    if Mp != M:
        x2 = jnp.pad(x2, ((0, Mp - M), (0, 0)))
    grid = (Mp // TM,)

    in_specs = [pl.BlockSpec((TM, L), lambda i: (i, 0))]
    for m in mats:                                         # grid-invariant operator factors
        in_specs.append(pl.BlockSpec(m.shape, lambda i: (0, 0),
                                     pipeline_mode=pl.Buffered(1)))
    in_specs.append(pl.BlockSpec((1, Np), lambda i: (0, 0),
                                 pipeline_mode=pl.Buffered(1)))
    out_specs = [pl.BlockSpec((TM, Np), lambda i: (i, 0)),
                 pl.BlockSpec((TM, Np), lambda i: (i, 0))]
    out_shapes = (jax.ShapeDtypeStruct((Mp, Np), out_dtype),
                  jax.ShapeDtypeStruct((Mp, Np), out_dtype))

    kernel = _fits_kernel_dense if mode == "dense" else _fits_kernel_factored

    xy_f, lxy_f = pl.pallas_call(
        kernel,
        out_shape=out_shapes,
        grid_spec=pltpu.PrefetchScalarGridSpec(
            num_scalar_prefetch=0,
            grid=grid,
            in_specs=in_specs,
            out_specs=out_specs),
        compiler_params=pltpu.CompilerParams(
            dimension_semantics=("parallel",),             # shard M tiles across TCs
            vmem_limit_bytes=vmem_limit),
    )(x2, *mats, b_low)

    xy = xy_f[:M, :N].reshape(B, C, N)
    lxy = lxy_f[:M, :N].reshape(B, C, N)
    # TODO(synk): for large enc_in (C >= 128) produce the second output directly
    # in [B, N, C] layout inside the kernel; with small C the XLA transpose is cheaper.
    return xy, jnp.transpose(lxy, (0, 2, 1))


# ----------------------------------------------------------------------------
# Pure-JAX reference (jnp.fft), mirrors the PyTorch forward (individual=False).
# ----------------------------------------------------------------------------
def reference_fits(x, wr, wi, br, bi, seq_len, pred_len, cut_freq, length_ratio):
    F2 = wr.shape[1]
    N = seq_len + pred_len
    xT = jnp.transpose(x, (0, 2, 1))                       # [B, L, C]
    mean = jnp.mean(xT, axis=1, keepdims=True)
    xc = xT - mean
    var = jnp.var(xc, axis=1, keepdims=True, ddof=1) + 1e-5
    xn = xc / jnp.sqrt(var)
    spec = jnp.fft.rfft(xn, axis=1)[:, :cut_freq, :]       # [B, F, C]
    W = (wr + 1j * wi).astype(jnp.complex64)               # [F, F2]
    bvec = (br + 1j * bi).astype(jnp.complex64)[0]         # [F2]
    y = jnp.einsum('bfc,fg->bgc', spec, W) + bvec[None, :, None]
    pad = jnp.zeros((x.shape[0], N // 2 + 1, x.shape[1]), dtype=y.dtype)
    pad = pad.at[:, :F2, :].set(y)
    low = jnp.fft.irfft(pad, n=N, axis=1) * length_ratio
    low_scaled = low * jnp.sqrt(var)                       # [B, N, C]
    xy = low_scaled + mean
    return jnp.transpose(xy, (0, 2, 1)), low_scaled


# ----------------------------------------------------------------------------
# Self-test
# ----------------------------------------------------------------------------
def _run_case(key, B, C, seq_len, pred_len, cut_freq, matmul_dtype, out_dtype, tol):
    length_ratio = (seq_len + pred_len) / seq_len
    F2 = int(cut_freq * length_ratio)

    kx, kwr, kwi, kbr, kbi = jax.random.split(key, 5)
    x = jax.random.normal(kx, (B, C, seq_len), dtype=jnp.float32)
    bound = 1.0 / np.sqrt(cut_freq)
    wr = jax.random.uniform(kwr, (cut_freq, F2), jnp.float32, -bound, bound)
    wi = jax.random.uniform(kwi, (cut_freq, F2), jnp.float32, -bound, bound)
    br = jax.random.uniform(kbr, (1, F2), jnp.float32, -bound, bound)
    bi = jax.random.uniform(kbi, (1, F2), jnp.float32, -bound, bound)

    op = make_fits_operator(seq_len, pred_len, cut_freq, wr, wi, br, bi,
                            length_ratio, matmul_dtype=matmul_dtype)
    xy, low_scaled = fits_forward(x, op, out_dtype=out_dtype)
    jax.block_until_ready(xy)
    jax.block_until_ready(low_scaled)

    xy_ref, low_ref = reference_fits(x, wr, wi, br, bi, seq_len, pred_len,
                                     cut_freq, length_ratio)
    err1 = float(jnp.max(jnp.abs(xy.astype(jnp.float32) - xy_ref)))
    err2 = float(jnp.max(jnp.abs(low_scaled.astype(jnp.float32) - low_ref)))
    assert err1 < tol and err2 < tol, (op[0], err1, err2, tol)


if __name__ == "__main__":
    key = jax.random.PRNGKey(0)
    k1, k2, k3 = jax.random.split(key, 3)

    # 1) Toy config (dense fused operator), f32 MXU path, tight tolerance.
    _run_case(k1, B=2, C=4, seq_len=16, pred_len=16, cut_freq=5,
              matmul_dtype=jnp.float32, out_dtype=jnp.float32, tol=1e-3)

    # 2) Config where the low-rank factored operator (two chained matmuls) kicks in.
    _run_case(k2, B=2, C=4, seq_len=256, pred_len=256, cut_freq=16,
              matmul_dtype=jnp.float32, out_dtype=jnp.float32, tol=1e-3)

    # 3) Opt-in bf16 MXU inputs + bf16 outputs (review item); accuracy here is
    #    bounded by bf16 rounding of O(1) values, hence the loose tolerance.
    _run_case(k3, B=2, C=4, seq_len=16, pred_len=16, cut_freq=5,
              matmul_dtype=jnp.bfloat16, out_dtype=jnp.bfloat16, tol=2.5e-1)

    print("KERNEL_OK")
</pallas_src>

<mosaic_0001>
module attributes {stable_mosaic.version = 11 : i64} {
  func.func @_fits_kernel_dense(%arg0: i32, %arg1: memref<8x16xf32, #tpu.memory_space<vmem>>, %arg2: memref<16x32xf32, #tpu.memory_space<vmem>>, %arg3: memref<1x32xf32, #tpu.memory_space<vmem>>, %arg4: memref<8x32xf32, #tpu.memory_space<vmem>>, %arg5: memref<8x32xf32, #tpu.memory_space<vmem>>) attributes {dimension_semantics = [#tpu.dimension_semantics<parallel>], iteration_bounds = array<i64: 1>, scalar_prefetch = 0 : i64, scratch_operands = 0 : i64, tpu.core_type = #tpu.core_type<tc>, window_params = [{transform_indices = @transform_0, window_bounds = array<i64: 8, 16>}, {pipeline_mode = #tpu.pipeline_mode<synchronous>, transform_indices = @transform_1, window_bounds = array<i64: 16, 32>}, {pipeline_mode = #tpu.pipeline_mode<synchronous>, transform_indices = @transform_2, window_bounds = array<i64: 1, 32>}, {transform_indices = @transform_3, window_bounds = array<i64: 8, 32>}, {transform_indices = @transform_4, window_bounds = array<i64: 8, 32>}]} {
    %c0 = arith.constant 0 : index
    %c0_0 = arith.constant 0 : index
    %0 = vector.load %arg1[%c0, %c0_0] : memref<8x16xf32, #tpu.memory_space<vmem>>, vector<8x16xf32>
    %cst = arith.constant dense<0.000000e+00> : vector<8xf32>
    %1 = vector.multi_reduction <add>, %0, %cst [1] : vector<8x16xf32> to vector<8xf32>
    %2 = vector.shape_cast %1 : vector<8xf32> to vector<8x1xf32>
    %cst_1 = arith.constant 1.600000e+01 : f32
    %3 = vector.broadcast %cst_1 : f32 to vector<8x1xf32>
    %4 = arith.divf %2, %3 : vector<8x1xf32>
    %5 = vector.broadcast %4 : vector<8x1xf32> to vector<8x16xf32>
    %6 = arith.subf %0, %5 : vector<8x16xf32>
    %7 = arith.mulf %6, %6 : vector<8x16xf32>
    %cst_2 = arith.constant dense<0.000000e+00> : vector<8xf32>
    %8 = vector.multi_reduction <add>, %7, %cst_2 [1] : vector<8x16xf32> to vector<8xf32>
    %9 = vector.shape_cast %8 : vector<8xf32> to vector<8x1xf32>
    %cst_3 = arith.constant 0.0666666701 : f32
    %10 = vector.broadcast %cst_3 : f32 to vector<8x1xf32>
    %11 = arith.mulf %9, %10 : vector<8x1xf32>
    %cst_4 = arith.constant 9.99999974E-6 : f32
    %12 = vector.broadcast %cst_4 : f32 to vector<8x1xf32>
    %13 = arith.addf %11, %12 : vector<8x1xf32>
    %14 = math.rsqrt %13 : vector<8x1xf32>
    %15 = arith.mulf %13, %14 : vector<8x1xf32>
    %16 = vector.broadcast %14 : vector<8x1xf32> to vector<8x16xf32>
    %17 = arith.mulf %6, %16 : vector<8x16xf32>
    %c0_5 = arith.constant 0 : index
    %c0_6 = arith.constant 0 : index
    %18 = vector.load %arg2[%c0_5, %c0_6] : memref<16x32xf32, #tpu.memory_space<vmem>>, vector<16x32xf32>
    %cst_7 = arith.constant dense<0.000000e+00> : vector<8x32xf32>
    %19 = tpu.matmul %17, %18, %cst_7 {dimension_numbers = #tpu.dot_dimension_numbers<[1], [0], [0], [1], [0, 0, 1, 1], [], []>} : vector<8x16xf32>, vector<16x32xf32>, vector<8x32xf32> -> vector<8x32xf32>
    %c0_8 = arith.constant 0 : index
    %c0_9 = arith.constant 0 : index
    %20 = vector.load %arg3[%c0_8, %c0_9] : memref<1x32xf32, #tpu.memory_space<vmem>>, vector<1x32xf32>
    %21 = vector.broadcast %20 : vector<1x32xf32> to vector<8x32xf32>
    %22 = arith.addf %19, %21 : vector<8x32xf32>
    %23 = vector.broadcast %15 : vector<8x1xf32> to vector<8x32xf32>
    %24 = arith.mulf %22, %23 : vector<8x32xf32>
    %25 = vector.broadcast %4 : vector<8x1xf32> to vector<8x32xf32>
    %26 = arith.addf %24, %25 : vector<8x32xf32>
    %c0_10 = arith.constant 0 : index
    %c0_11 = arith.constant 0 : index
    %27 = vector.load %arg4[%c0_10, %c0_11] : memref<8x32xf32, #tpu.memory_space<vmem>>, vector<8x32xf32>
    tpu.vector_store %arg4[%c0_10, %c0_11], %26 {strides = array<i32>} : memref<8x32xf32, #tpu.memory_space<vmem>>, vector<8x32xf32>,
    %c0_12 = arith.constant 0 : index
    %c0_13 = arith.constant 0 : index
    %28 = vector.load %arg5[%c0_12, %c0_13] : memref<8x32xf32, #tpu.memory_space<vmem>>, vector<8x32xf32>
    tpu.vector_store %arg5[%c0_12, %c0_13], %24 {strides = array<i32>} : memref<8x32xf32, #tpu.memory_space<vmem>>, vector<8x32xf32>,
    return
  }
  func.func @transform_0(%arg0: i32) -> (i32, i32) {
    %c0_i32 = arith.constant 0 : i32
    %c0_i32_0 = arith.constant 0 : i32
    return %arg0, %c0_i32 : i32, i32
  }
  func.func @transform_1(%arg0: i32) -> (i32, i32) {
    %c0_i32 = arith.constant 0 : i32
    %c0_i32_0 = arith.constant 0 : i32
    %c0_i32_1 = arith.constant 0 : i32
    return %c0_i32, %c0_i32_0 : i32, i32
  }
  func.func @transform_2(%arg0: i32) -> (i32, i32) {
    %c0_i32 = arith.constant 0 : i32
    %c0_i32_0 = arith.constant 0 : i32
    %c0_i32_1 = arith.constant 0 : i32
    return %c0_i32, %c0_i32_0 : i32, i32
  }
  func.func @transform_3(%arg0: i32) -> (i32, i32) {
    %c0_i32 = arith.constant 0 : i32
    %c0_i32_0 = arith.constant 0 : i32
    return %arg0, %c0_i32 : i32, i32
  }
  func.func @transform_4(%arg0: i32) -> (i32, i32) {
    %c0_i32 = arith.constant 0 : i32
    %c0_i32_0 = arith.constant 0 : i32
    return %arg0, %c0_i32 : i32, i32
  }
}

</mosaic_0001>

<bundles_post_ra>
// kernel: tpu_custom_call.1
= control target key start
LH: loop header
LB: loop body
LE: loop exit
PB: predicated region body
PF: predicated region fallthrough
CT: control target
= control target key end

     0   :  { %10 = vsyncpa [#allocation3], 0  ;;  %s397_s0 = inlined_call_operand.hbm [shape: f32[8,16], index: 0, kind: input, shape index: {}]   ;;  %s398_s1 = inlined_call_operand.hbm [shape: f32[16,32], index: 1, kind: input, shape index: {}]   ;;  %s399_s2 = inlined_call_operand.vmem [shape: f32[1,32], index: 2, kind: input, shape index: {}]   ;;  %s400_s3 = inlined_call_operand.hbm [shape: f32[8,32], index: 3, kind: output, shape index: {0}]   ;;  %s401_s4 = inlined_call_operand.hbm [shape: f32[8,32], index: 4, kind: output, shape index: {1}]  }
   0x1   :  { %11 = vsyncpa [#allocation6], 0 }
   0x2   :  { %12 = vsyncpa [#allocation4], 0 }
   0x3   :  { %13 = vsyncpa [#allocation9], 0  ;;  %s300_s15 = smov [#allocation2]   ;;  %s301_s17 = smov [#allocation5]  }
   0x4   :  { %s20_s16 = sshll.u32 %s300_s15, 4  ;;  %s29_s18 = sshll.u32 %s301_s17, 4  ;;  %s21_s16 = int_to_ptr.vmem [resolvable:$true] %s20_s16  ;;  %s334_s18 = int_to_ptr.vmem [resolvable:$true] %s29_s18 }
   0x5   :  { %s204_s21 = scalar_lea.hbm %s397_s0, 128 }
   0x6   :  { %p205_p0 = scmp.ne.s32.totalorder %s397_s0, %s204_s21  ;;  %p208_p1 = scmp.lt.u32.totalorder %s204_s21, %s397_s0 }
   0x8   :  { %p210_p2 = pnand %p208_p1, %p205_p0 }
   0xa   :  { %213 = shalt.err (!%p210_p2)
}
   0xb   :  { %s214_s26 = scalar_lea.vmem %s21_s16, 128  ;;  %p219_p4 = scmp.lt.s32.totalorder %s21_s16, %s21_s16 }
   0xc   :  { %p215_p3 = scmp.ne.s32.totalorder %s21_s16, %s214_s26  ;;  %p220_p5 = scmp.lt.s32.totalorder %s214_s26, %s214_s26 }
   0xe   :  { %p221_p6 = por %p220_p5, %p219_p4 }
  0x10   :  { %p222_p7 = pnand %p221_p6, %p215_p3 }
  0x12   :  { %225 = shalt.err (!%p222_p7)
}
  0x13   :  { %23 = dma.hbm_to_vmem [thread:$0]  %s397_s0, 128, %s21_s16, [#allocation3]  }
  0x14   :  { %s226_s5 = scalar_lea.hbm %s398_s1, 256 }
  0x15   :  { %p227_p8 = scmp.ne.s32.totalorder %s398_s1, %s226_s5  ;;  %p230_p9 = scmp.lt.u32.totalorder %s226_s5, %s398_s1 }
  0x17   :  { %p232_p10 = pnand %p230_p9, %p227_p8 }
  0x19   :  { %235 = shalt.err (!%p232_p10)
}
  0x1a   :  { %s236_s10 = scalar_lea.vmem %s334_s18, 256  ;;  %p241_p12 = scmp.lt.s32.totalorder %s334_s18, %s334_s18 }
  0x1b   :  { %p237_p11 = scmp.ne.s32.totalorder %s334_s18, %s236_s10  ;;  %p242_p13 = scmp.lt.s32.totalorder %s236_s10, %s236_s10 }
  0x1d   :  { %p243_p0 = por %p242_p13, %p241_p12 }
  0x1f   :  { %p244_p1 = pnand %p243_p0, %p237_p11 }
  0x21   :  { %247 = shalt.err (!%p244_p1)
}
  0x22   :  { %s302_s0 = smov 128   ;;  %s303_s11 = smov 8  }
  0x23   :  { %35 = dma.hbm_to_vmem [thread:$0]  %s398_s1, 256, %s334_s18, [#allocation6], %s302_s0, %s302_s0, %s303_s11  }
  0x24   :  { %292 = dma.done.wait [#allocation3], 128  }
  0x25   :  { %293 = vsyncadd [#allocation3], 4294967168 }
  0x26   :  { %294 = dma.done.wait [#allocation6], 256  }
  0x27   :  { %295 = vsyncadd [#allocation6], 4294967040  ;;  %vm45_vm0 = vcmask 130048   ;;  %v44_v0 = vld [vmem:[#allocation2] sm:$0xff]  ;;  %v61_v7 = vld [vmem:[#allocation5] sm:$0xff]  ;;  %v304_v10 = vmov 0.0|0.0  }
  0x28   :  { %v46_v1 = vsel %vm45_vm0, %v44_v0, 0.0  ;;  %v62_v8 = vld [vmem:[#allocation5 + $0x8] sm:$0xff]  ;;  %190 = vmatprep.subr.bf16.mxu0 %v304_v10  ;;  %vm305_vm1 = vmmov 0   ;;  %v306_v11 = vmov 0.0   ;;  %v178_v18 = vld [vmem:[%s399_s2] ss:$0 sm:$0xff] }
  0x29   :  { %47 = vadd.xlane.f32.xlu0 %v46_v1  ;;  %v191_v9 = vpack.c.bf16 %v62_v8, %v61_v7  ;;  %187 = vmatprep.mubr.msk.f32.mxu0 %vm305_vm1, %v306_v11  ;;  %s307_s15 = smov [#allocation8]   ;;  %vm145_vm2 = vcmask 261120   ;;  %s308_s17 = smov [#allocation7]  }
  0x2a   :  { %s164_s16 = sshll.u32 %s307_s15, 4  ;;  %s154_s18 = sshll.u32 %s308_s17, 4  ;;  %s165_s16 = int_to_ptr.vmem [resolvable:$true] %s164_s16  ;;  %s155_s18 = int_to_ptr.vmem [resolvable:$true] %s154_s18 }
  0x2b   :  { %192 = vmatpush3.bf16.msra.mxu0 %v191_v9  ;;  %s248_s19 = scalar_lea.vmem %s165_s16, 128  ;;  %p253_p3 = scmp.lt.s32.totalorder %s165_s16, %s165_s16 }
  0x2c   :  { %p249_p2 = scmp.ne.s32.totalorder %s165_s16, %s248_s19  ;;  %p254_p4 = scmp.lt.s32.totalorder %s248_s19, %s248_s19 }
  0x2e   :  { %p255_p5 = por %p254_p4, %p253_p3 }
  0x30   :  { %p256_p6 = pnand %p255_p5, %p249_p2 }
  0xb6   :  { %v48_v2 = vpop.xlane.xlu0 %47 }
  0xb7   :  { %v50_v3 = vmul.f32 0.0625, %v48_v2 }
  0xb9   :  { %v51_v4 = vsub.f32 %v44_v0, %v50_v3 }
  0xbb   :  { %v52_v5 = vmul.f32 %v51_v4, %v51_v4 }
  0xbd   :  { %v53_v6 = vsel %vm45_vm0, %v52_v5, 0.0 }
  0xbe   :  { %54 = vadd.xlane.f32.xlu0 %v53_v6 }
 0x14b   :  { %v55_v12 = vpop.xlane.xlu0 %54 }
 0x14c   :  { %v56_v13 = vmul.f32 0.06666667, %v55_v12 }
 0x14e   :  { %v57_v14 = vadd.f32 1e-05, %v56_v13 }
 0x150   :  { %202 = vrsqrt.f32 %v57_v14 }
 0x15a   :  { %v203_v15 = vpop.eup %202 }
 0x15b   :  { %v59_v16 = vmul.f32 %v203_v15, %v57_v14  ;;  %v60_v17 = vmul.f32 %v203_v15, %v51_v4 }
 0x15d   :  { %188 = vmatmul.mubr.msk.f32.vlgmr.msra.gmra.mrb[0].mxu0 %vm45_vm0, %v60_v17 }
 0x230   :  { %v139_v19 = vpop.f32.mrb[0].mxu0 }
 0x231   :  { %v140_v20 = vadd.f32 %v178_v18, %v139_v19  ;;  %v189_v21 = vpop.f32.mrb[1].mxu0 }
 0x233   :  { %v143_v22 = vmul.f32 %v140_v20, %v59_v16 }
 0x235   :  { %v144_v23 = vadd.f32 %v143_v22, %v50_v3  ;;  %147 = vst.msk [vmem:[#allocation8] sm:$0xff] %vm145_vm2, %v143_v22 }
 0x236   :  { %259 = shalt.err (!%p256_p6)
}
 0x237   :  { %s260_s21 = scalar_lea.hbm %s401_s4, 128 }
 0x238   :  { %p261_p7 = scmp.ne.s32.totalorder %s401_s4, %s260_s21  ;;  %p264_p8 = scmp.lt.u32.totalorder %s260_s21, %s401_s4 }
 0x23a   :  { %p266_p9 = pnand %p264_p8, %p261_p7 }
 0x23c   :  { %269 = shalt.err (!%p266_p9)
}
 0x23d   :  { %167 = dma.vmem_to_hbm [thread:$0]  %s165_s16, 128, %s401_s4, [#allocation9]   ;;  %146 = vst.msk [vmem:[#allocation7] sm:$0xff] %vm145_vm2, %v144_v23 }
 0x23e   :  { %s270_s28 = scalar_lea.vmem %s155_s18, 128  ;;  %p275_p11 = scmp.lt.s32.totalorder %s155_s18, %s155_s18 }
 0x23f   :  { %p271_p10 = scmp.ne.s32.totalorder %s155_s18, %s270_s28  ;;  %p276_p12 = scmp.lt.s32.totalorder %s270_s28, %s270_s28 }
 0x241   :  { %p277_p13 = por %p276_p12, %p275_p11 }
 0x243   :  { %p278_p0 = pnand %p277_p13, %p271_p10 }
 0x245   :  { %281 = shalt.err (!%p278_p0)
}
 0x246   :  { %s282_s5 = scalar_lea.hbm %s400_s3, 128 }
 0x247   :  { %p283_p1 = scmp.ne.s32.totalorder %s400_s3, %s282_s5  ;;  %p286_p2 = scmp.lt.u32.totalorder %s282_s5, %s400_s3 }
 0x249   :  { %p288_p3 = pnand %p286_p2, %p283_p1 }
 0x24b   :  { %291 = shalt.err (!%p288_p3)
}
 0x24c   :  { %157 = dma.vmem_to_hbm [thread:$0]  %s155_s18, 128, %s400_s3, [#allocation4]  }
 0x24d   :  { %296 = dma.done.wait [#allocation4], 128  }
 0x24e   :  { %297 = vsyncadd [#allocation4], 4294967168 }
 0x24f   :  { %298 = dma.done.wait [#allocation9], 128  }
 0x250   :  { %299 = vsyncadd [#allocation9], 4294967168 }
 0x251   :  { %174 = vsyncpa [#allocation3], 1 }
 0x252   :  { %175 = vsyncpa [#allocation6], 1 }
 0x253   :  { %176 = vsyncpa [#allocation4], 1 }
 0x254   :  { %177 = vsyncpa [#allocation9], 1 }

</bundles_post_ra>
